<compile_context>
chip_gen: v6e
topology: v6e:2x2x1
jax: 0.10.0
libtpu: 0.0.40
codegen_flags: <defaults>
</compile_context>

<pallas_src>
import jax
import jax.numpy as jnp
from jax import lax
from jax.experimental import pallas as pl
from jax.experimental.pallas import tpu as pltpu


def _round_up(x, m):
    return ((x + m - 1) // m) * m


# ----------------------------------------------------------------------------
# Fused slot head + masked cross-entropy partials (grid-tiled Pallas kernel)
# ----------------------------------------------------------------------------
def _slot_kernel(seq_ref, ctx_ref, lab_ref, w1_ref, w2_ref, b2_ref,
                 logits_ref, loss_parts_ref, mask_parts_ref):
    # --- head: relu(seq @ W1_seq + (ctx @ W1_ctx + b1)) @ W2 + b2 ------------
    x = seq_ref[0]                                           # (tile_t, H) bf16
    h = jnp.dot(x, w1_ref[...], preferred_element_type=jnp.float32)
    h = jnp.maximum(h + ctx_ref[0], 0.0)                     # ctx bias holds b1
    logits = jnp.dot(h.astype(jnp.bfloat16), w2_ref[...],
                     preferred_element_type=jnp.float32) + b2_ref[...]
    logits_ref[0] = logits.astype(logits_ref.dtype)          # bf16 HBM store

    # --- fused masked cross-entropy partial sums (f32) -----------------------
    # Padded classes already carry -1e30 via b2, so no class mask is needed:
    # exp(-1e30 - zmax) underflows to 0 and onehot is 0 at padded columns.
    lab = lab_ref[0]                                         # (tile_t, 1), -1 = inactive
    col = lax.broadcasted_iota(jnp.int32, logits.shape, 1)
    onehot = (col == lab).astype(jnp.float32)                # all-zero row if inactive
    zmax = jnp.max(logits, axis=-1, keepdims=True)
    lse = zmax + jnp.log(jnp.sum(jnp.exp(logits - zmax), axis=-1, keepdims=True))
    contrib = onehot * (lse - logits)                        # per-row CE at label col
    loss_parts_ref[0, 0] = jnp.sum(contrib, axis=0, keepdims=True)
    mask_parts_ref[0, 0] = jnp.sum(onehot, axis=0, keepdims=True)


def slot_head_and_loss(seq, ctx_bias, tag_seq, tag_mask, w1_seq, w2, b2):
    """seq: (B, T, H). ctx_bias: (B, U) = ctx @ W1[:H] + b1.

    Returns (logits_padded (B, t_pad, s_pad) bf16, slot_loss scalar f32).
    Padded classes carry -1e30 so downstream argmax/softmax stay correct.
    """
    B, T, H = seq.shape
    U = w1_seq.shape[1]
    S = w2.shape[1]
    u_pad = _round_up(U, 128)
    s_pad = _round_up(S, 128)
    tile_t = min(512, _round_up(T, 16))        # bf16 sublane packing, big tiles
    t_pad = _round_up(T, tile_t)
    nt = t_pad // tile_t

    seq_p = jnp.pad(seq.astype(jnp.bfloat16), ((0, 0), (0, t_pad - T), (0, 0)))
    ctx_p = jnp.pad(ctx_bias.astype(jnp.float32),
                    ((0, 0), (0, u_pad - U))).reshape(B, 1, u_pad)
    lab = jnp.where(tag_mask == 1, tag_seq, -1).astype(jnp.int32)
    lab = jnp.pad(lab, ((0, 0), (0, t_pad - T)), constant_values=-1)
    lab = lab.reshape(B, t_pad, 1)
    w1_p = jnp.pad(w1_seq.astype(jnp.bfloat16), ((0, 0), (0, u_pad - U)))
    w2_p = jnp.pad(w2.astype(jnp.bfloat16), ((0, u_pad - U), (0, s_pad - S)))
    # -1e30 (finite!) bias on padded classes: kills them in softmax/argmax and
    # keeps onehot * (lse - logits) finite in the kernel.
    b2_p = jnp.pad(b2.astype(jnp.float32), (0, s_pad - S),
                   constant_values=-1e30).reshape(1, s_pad)

    grid = (B, nt)
    logits_pad, loss_parts, mask_parts = pl.pallas_call(
        _slot_kernel,
        grid=grid,
        in_specs=[
            pl.BlockSpec((1, tile_t, H), lambda b, t: (b, t, 0)),     # seq tile
            pl.BlockSpec((1, 1, u_pad), lambda b, t: (b, 0, 0)),      # ctx+b1 bias
            pl.BlockSpec((1, tile_t, 1), lambda b, t: (b, t, 0)),     # labels
            pl.BlockSpec((H, u_pad), lambda b, t: (0, 0)),            # W1 (resident)
            pl.BlockSpec((u_pad, s_pad), lambda b, t: (0, 0)),        # W2 (resident)
            pl.BlockSpec((1, s_pad), lambda b, t: (0, 0)),            # b2 (resident)
        ],
        out_specs=(
            pl.BlockSpec((1, tile_t, s_pad), lambda b, t: (b, t, 0)),    # logits (bf16)
            pl.BlockSpec((1, 1, 1, s_pad), lambda b, t: (b, t, 0, 0)),   # CE partials
            pl.BlockSpec((1, 1, 1, s_pad), lambda b, t: (b, t, 0, 0)),   # mask partials
        ),
        out_shape=(
            jax.ShapeDtypeStruct((B, t_pad, s_pad), jnp.bfloat16),
            jax.ShapeDtypeStruct((B, nt, 1, s_pad), jnp.float32),
            jax.ShapeDtypeStruct((B, nt, 1, s_pad), jnp.float32),
        ),
        compiler_params=pltpu.CompilerParams(
            dimension_semantics=("parallel", "parallel"),
            vmem_limit_bytes=32 * 1024 * 1024,
        ),
    )(seq_p, ctx_p, lab, w1_p, w2_p, b2_p)

    loss_sum = jnp.sum(loss_parts)
    mask_sum = jnp.sum(mask_parts)
    # NOTE: clamp keeps a finite value when no tags are active (PyTorch -> NaN).
    slot_loss = loss_sum / jnp.maximum(mask_sum, 1.0)
    return logits_pad, slot_loss


# ----------------------------------------------------------------------------
# Deterministic parameter construction (synthetic, no checkpoint)
# ----------------------------------------------------------------------------
def xavier_uniform(key, fan_in, fan_out):
    bound = jnp.sqrt(6.0 / (fan_in + fan_out))
    return jax.random.uniform(key, (fan_in, fan_out), jnp.float32, -bound, bound)


def linear_bias(key, fan_in, fan_out):
    bound = 1.0 / jnp.sqrt(jnp.float32(fan_in))
    return jax.random.uniform(key, (fan_out,), jnp.float32, -bound, bound)


def make_params(key, vocab, hidden_size, hidden_units, slot_dim, intent_dim,
                context=True):
    feat = 2 * hidden_size if context else hidden_size
    ks = jax.random.split(key, 10)
    return {
        # BERT stand-in
        "emb": 0.1 * jax.random.normal(ks[0], (vocab, hidden_size), jnp.float32),
        "w_pool": xavier_uniform(ks[1], hidden_size, hidden_size),
        "b_pool": jnp.zeros((hidden_size,), jnp.float32),
        # joint head (matches JointWithBert.__init__ with hidden_units > 0, context)
        "w_slot_hidden": xavier_uniform(ks[2], feat, hidden_units),
        "b_slot_hidden": linear_bias(ks[3], feat, hidden_units),
        "w_intent_hidden": xavier_uniform(ks[4], feat, hidden_units),
        "b_intent_hidden": linear_bias(ks[5], feat, hidden_units),
        "w_slot_cls": xavier_uniform(ks[6], hidden_units, slot_dim),
        "b_slot_cls": linear_bias(ks[7], hidden_units, slot_dim),
        "w_intent_cls": xavier_uniform(ks[8], hidden_units, intent_dim),
        "b_intent_cls": linear_bias(ks[9], hidden_units, intent_dim),
        "intent_weight": jnp.ones((intent_dim,), jnp.float32),
    }


# ----------------------------------------------------------------------------
# BERT stand-in (plain JAX glue) + module forward
# ----------------------------------------------------------------------------
def bert_stub(params, ids, mask):
    emb = params["emb"][ids]                                 # (B, T, H)
    seq = jnp.tanh(emb) * mask.astype(jnp.float32)[..., None]
    pooled = jnp.tanh(seq[:, 0, :] @ params["w_pool"] + params["b_pool"])
    return seq, pooled


def joint_with_bert_forward(params, word_seq, word_mask, tag_seq, tag_mask,
                            intent_tensor, ctx_seq, ctx_mask):
    sequence_output, pooled_output = bert_stub(params, word_seq, word_mask)
    context_output = bert_stub(params, ctx_seq, ctx_mask)[1]

    B, T, H = sequence_output.shape

    # Algebraic replacement of cat([ctx.repeat(T), seq], -1) @ W1_slot:
    # the per-batch context contribution (+ b1, folded here per perf review)
    # is a tiny (B, U) matmul; the per-token part runs in the Pallas kernel.
    w1_slot = params["w_slot_hidden"]                        # (2H, U)
    ctx_bias = context_output @ w1_slot[:H, :] + params["b_slot_hidden"]

    slot_logits_pad, slot_loss = slot_head_and_loss(
        sequence_output, ctx_bias, tag_seq, tag_mask,
        w1_slot[H:, :], params["w_slot_cls"], params["b_slot_cls"])

    # Only the (padded) time axis is sliced back; the class axis stays
    # lane-padded (padded classes carry -1e30, so argmax/softmax downstream
    # are unchanged and we avoid an extra HBM copy of the biggest tensor).
    slot_logits = slot_logits_pad[:, :T, :]

    # Intent head + BCEWithLogits(pos_weight) in plain XLA: the matmuls are
    # (B, 2H)@(2H, U)@(U, I) with tiny B, so a dedicated pallas_call would be
    # launch-latency dominated (perf review). XLA fuses the elementwise chain.
    pooled_cat = jnp.concatenate([context_output, pooled_output], axis=-1)
    h_int = jax.nn.relu(pooled_cat @ params["w_intent_hidden"]
                        + params["b_intent_hidden"])
    intent_logits = h_int @ params["w_intent_cls"] + params["b_intent_cls"]
    y = intent_tensor.astype(jnp.float32)
    pw = params["intent_weight"]
    intent_loss = jnp.mean(pw * y * jax.nn.softplus(-intent_logits)
                           + (1.0 - y) * jax.nn.softplus(intent_logits))

    return slot_logits, intent_logits, slot_loss, intent_loss


# ----------------------------------------------------------------------------
# Pure-JAX reference (f32) for correctness checking
# ----------------------------------------------------------------------------
def reference_forward(params, word_seq, word_mask, tag_seq, tag_mask,
                      intent_tensor, ctx_seq, ctx_mask):
    seq, pooled = bert_stub(params, word_seq, word_mask)
    ctx = bert_stub(params, ctx_seq, ctx_mask)[1]
    B, T, H = seq.shape
    seq_cat = jnp.concatenate(
        [jnp.broadcast_to(ctx[:, None, :], (B, T, H)), seq], axis=-1)
    h = jax.nn.relu(seq_cat @ params["w_slot_hidden"] + params["b_slot_hidden"])
    slot_logits = h @ params["w_slot_cls"] + params["b_slot_cls"]
    logp = jax.nn.log_softmax(slot_logits, axis=-1)
    ce = -jnp.take_along_axis(logp, tag_seq[..., None], axis=-1)[..., 0]
    active = (tag_mask == 1).astype(jnp.float32)
    slot_loss = jnp.sum(ce * active) / jnp.maximum(jnp.sum(active), 1.0)

    pooled_cat = jnp.concatenate([ctx, pooled], axis=-1)
    h_int = jax.nn.relu(pooled_cat @ params["w_intent_hidden"]
                        + params["b_intent_hidden"])
    intent_logits = h_int @ params["w_intent_cls"] + params["b_intent_cls"]
    y = intent_tensor.astype(jnp.float32)
    pw = params["intent_weight"]
    intent_loss = jnp.mean(pw * y * jax.nn.softplus(-intent_logits)
                           + (1.0 - y) * jax.nn.softplus(intent_logits))
    return slot_logits, intent_logits, slot_loss, intent_loss


# ----------------------------------------------------------------------------
if __name__ == "__main__":
    B, T = 2, 8
    VOCAB = 30
    HIDDEN_SIZE = 32          # bert.config.hidden_size stand-in
    HIDDEN_UNITS = 64         # model_config['hidden_units']
    SLOT_DIM = 12
    INTENT_DIM = 10
    S_PAD = _round_up(SLOT_DIM, 128)

    key = jax.random.PRNGKey(0)
    k_param, k_w, k_c, k_tag, k_tm, k_int = jax.random.split(key, 6)

    params = make_params(k_param, VOCAB, HIDDEN_SIZE, HIDDEN_UNITS,
                         SLOT_DIM, INTENT_DIM, context=True)

    word_seq_tensor = jax.random.randint(k_w, (B, T), 0, VOCAB, jnp.int32)
    word_mask_tensor = jnp.ones((B, T), jnp.int32)
    context_seq_tensor = jax.random.randint(k_c, (B, T), 0, VOCAB, jnp.int32)
    context_mask_tensor = jnp.ones((B, T), jnp.int32)
    tag_seq_tensor = jax.random.randint(k_tag, (B, T), 0, SLOT_DIM, jnp.int32)
    tag_mask_tensor = jax.random.randint(k_tm, (B, T), 0, 2, jnp.int32)
    intent_tensor = jax.random.bernoulli(k_int, 0.3, (B, INTENT_DIM)).astype(jnp.float32)

    args = (params, word_seq_tensor, word_mask_tensor, tag_seq_tensor,
            tag_mask_tensor, intent_tensor, context_seq_tensor,
            context_mask_tensor)

    fwd = jax.jit(joint_with_bert_forward)
    slot_logits, intent_logits, slot_loss, intent_loss = fwd(*args)
    jax.block_until_ready((slot_logits, intent_logits, slot_loss, intent_loss))

    # Shapes: slot logits keep the lane-padded class axis (padded classes = -1e30).
    assert slot_logits.shape == (B, T, S_PAD)
    assert slot_logits[..., :SLOT_DIM].shape == (B, T, SLOT_DIM)
    assert intent_logits.shape == (B, INTENT_DIM)
    assert slot_loss.shape == () and intent_loss.shape == ()
    assert bool(jnp.isfinite(slot_loss)) and bool(jnp.isfinite(intent_loss))
    assert bool(jnp.all(jnp.isfinite(slot_logits[..., :SLOT_DIM].astype(jnp.float32))))

    # Correctness vs pure-JAX f32 reference (loose tolerance: bf16 MXU inputs).
    ref_sl, ref_il, ref_sloss, ref_iloss = reference_forward(*args)
    assert bool(jnp.max(jnp.abs(
        slot_logits[..., :SLOT_DIM].astype(jnp.float32) - ref_sl)) < 0.1)
    assert bool(jnp.abs(slot_loss - ref_sloss) < 0.05 + 0.05 * jnp.abs(ref_sloss))
    assert bool(jnp.abs(intent_loss - ref_iloss) < 0.05 + 0.05 * jnp.abs(ref_iloss))

    print("KERNEL_OK")
</pallas_src>

<mosaic_0001>
module attributes {stable_mosaic.version = 11 : i64} {
  func.func @_slot_kernel(%arg0: i32, %arg1: i32, %arg2: memref<1x16x32xbf16, #tpu.memory_space<vmem>>, %arg3: memref<1x1x128xf32, #tpu.memory_space<vmem>>, %arg4: memref<1x16x1xi32, #tpu.memory_space<vmem>>, %arg5: memref<32x128xbf16, #tpu.memory_space<vmem>>, %arg6: memref<128x128xbf16, #tpu.memory_space<vmem>>, %arg7: memref<1x128xf32, #tpu.memory_space<vmem>>, %arg8: memref<1x16x128xbf16, #tpu.memory_space<vmem>>, %arg9: memref<1x1x1x128xf32, #tpu.memory_space<vmem>>, %arg10: memref<1x1x1x128xf32, #tpu.memory_space<vmem>>) attributes {dimension_semantics = [#tpu.dimension_semantics<parallel>, #tpu.dimension_semantics<parallel>], iteration_bounds = array<i64: 2, 1>, scalar_prefetch = 0 : i64, scratch_operands = 0 : i64, tpu.core_type = #tpu.core_type<tc>, window_params = [{transform_indices = @transform_0, window_bounds = array<i64: 1, 16, 32>}, {transform_indices = @transform_1, window_bounds = array<i64: 1, 1, 128>}, {transform_indices = @transform_2, window_bounds = array<i64: 1, 16, 1>}, {pipeline_mode = #tpu.pipeline_mode<synchronous>, transform_indices = @transform_3, window_bounds = array<i64: 32, 128>}, {pipeline_mode = #tpu.pipeline_mode<synchronous>, transform_indices = @transform_4, window_bounds = array<i64: 128, 128>}, {pipeline_mode = #tpu.pipeline_mode<synchronous>, transform_indices = @transform_5, window_bounds = array<i64: 1, 128>}, {transform_indices = @transform_6, window_bounds = array<i64: 1, 16, 128>}, {transform_indices = @transform_7, window_bounds = array<i64: 1, 1, 1, 128>}, {transform_indices = @transform_8, window_bounds = array<i64: 1, 1, 1, 128>}]} {
    %c0 = arith.constant 0 : index
    %c0_0 = arith.constant 0 : index
    %c0_1 = arith.constant 0 : index
    %0 = vector.load %arg2[%c0, %c0_0, %c0_1] : memref<1x16x32xbf16, #tpu.memory_space<vmem>>, vector<1x16x32xbf16>
    %1 = vector.shape_cast %0 : vector<1x16x32xbf16> to vector<16x32xbf16>
    %c0_2 = arith.constant 0 : index
    %c0_3 = arith.constant 0 : index
    %2 = vector.load %arg5[%c0_2, %c0_3] : memref<32x128xbf16, #tpu.memory_space<vmem>>, vector<32x128xbf16>
    %cst = arith.constant dense<0.000000e+00> : vector<16x128xf32>
    %3 = tpu.matmul %1, %2, %cst {dimension_numbers = #tpu.dot_dimension_numbers<[1], [0], [0], [1], [0, 0, 1, 1], [], []>} : vector<16x32xbf16>, vector<32x128xbf16>, vector<16x128xf32> -> vector<16x128xf32>
    %c0_4 = arith.constant 0 : index
    %c0_5 = arith.constant 0 : index
    %c0_6 = arith.constant 0 : index
    %4 = vector.load %arg3[%c0_4, %c0_5, %c0_6] : memref<1x1x128xf32, #tpu.memory_space<vmem>>, vector<1x1x128xf32>
    %5 = vector.shape_cast %4 : vector<1x1x128xf32> to vector<1x128xf32>
    %6 = vector.broadcast %5 : vector<1x128xf32> to vector<16x128xf32>
    %7 = arith.addf %3, %6 : vector<16x128xf32>
    %cst_7 = arith.constant 0.000000e+00 : f32
    %8 = vector.broadcast %cst_7 : f32 to vector<16x128xf32>
    %9 = arith.maximumf %7, %8 : vector<16x128xf32>
    %10 = arith.truncf %9 : vector<16x128xf32> to vector<16x128xbf16>
    %c0_8 = arith.constant 0 : index
    %c0_9 = arith.constant 0 : index
    %11 = vector.load %arg6[%c0_8, %c0_9] : memref<128x128xbf16, #tpu.memory_space<vmem>>, vector<128x128xbf16>
    %cst_10 = arith.constant dense<0.000000e+00> : vector<16x128xf32>
    %12 = tpu.matmul %10, %11, %cst_10 {dimension_numbers = #tpu.dot_dimension_numbers<[1], [0], [0], [1], [0, 0, 1, 1], [], []>} : vector<16x128xbf16>, vector<128x128xbf16>, vector<16x128xf32> -> vector<16x128xf32>
    %c0_11 = arith.constant 0 : index
    %c0_12 = arith.constant 0 : index
    %13 = vector.load %arg7[%c0_11, %c0_12] : memref<1x128xf32, #tpu.memory_space<vmem>>, vector<1x128xf32>
    %14 = vector.broadcast %13 : vector<1x128xf32> to vector<16x128xf32>
    %15 = arith.addf %12, %14 : vector<16x128xf32>
    %16 = arith.truncf %15 : vector<16x128xf32> to vector<16x128xbf16>
    %c0_13 = arith.constant 0 : index
    %c0_14 = arith.constant 0 : index
    %c0_15 = arith.constant 0 : index
    %17 = vector.load %arg8[%c0_13, %c0_14, %c0_15] : memref<1x16x128xbf16, #tpu.memory_space<vmem>>, vector<1x16x128xbf16>
    %18 = vector.shape_cast %17 : vector<1x16x128xbf16> to vector<16x128xbf16>
    %19 = vector.shape_cast %16 : vector<16x128xbf16> to vector<1x16x128xbf16>
    tpu.vector_store %arg8[%c0_13, %c0_14, %c0_15], %19 {strides = array<i32>} : memref<1x16x128xbf16, #tpu.memory_space<vmem>>, vector<1x16x128xbf16>,
    %c0_16 = arith.constant 0 : index
    %c0_17 = arith.constant 0 : index
    %c0_18 = arith.constant 0 : index
    %20 = vector.load %arg4[%c0_16, %c0_17, %c0_18] : memref<1x16x1xi32, #tpu.memory_space<vmem>>, vector<1x16x1xi32>
    %21 = vector.shape_cast %20 : vector<1x16x1xi32> to vector<16x1xi32>
    %22 = tpu.iota {dimensions = array<i32: 1>} : vector<16x128xi32>
    %23 = vector.broadcast %21 : vector<16x1xi32> to vector<16x128xi32>
    %24 = arith.cmpi eq, %22, %23 : vector<16x128xi32>
    %25 = arith.extui %24 : vector<16x128xi1> to vector<16x128xi32>
    %26 = arith.sitofp %25 : vector<16x128xi32> to vector<16x128xf32>
    %cst_19 = arith.constant dense<0xFF800000> : vector<16xf32>
    %27 = vector.multi_reduction <maximumf>, %15, %cst_19 [1] : vector<16x128xf32> to vector<16xf32>
    %28 = vector.shape_cast %27 : vector<16xf32> to vector<16x1xf32>
    %29 = vector.broadcast %28 : vector<16x1xf32> to vector<16x128xf32>
    %30 = arith.subf %15, %29 : vector<16x128xf32>
    %31 = math.exp %30 : vector<16x128xf32>
    %cst_20 = arith.constant dense<0.000000e+00> : vector<16xf32>
    %32 = vector.multi_reduction <add>, %31, %cst_20 [1] : vector<16x128xf32> to vector<16xf32>
    %33 = vector.shape_cast %32 : vector<16xf32> to vector<16x1xf32>
    %34 = math.log %33 : vector<16x1xf32>
    %35 = arith.addf %28, %34 : vector<16x1xf32>
    %36 = vector.broadcast %35 : vector<16x1xf32> to vector<16x128xf32>
    %37 = arith.subf %36, %15 : vector<16x128xf32>
    %38 = arith.mulf %26, %37 : vector<16x128xf32>
    %cst_21 = arith.constant dense<0.000000e+00> : vector<128xf32>
    %39 = vector.multi_reduction <add>, %38, %cst_21 [0] : vector<16x128xf32> to vector<128xf32>
    %40 = vector.shape_cast %39 : vector<128xf32> to vector<1x128xf32>
    %c0_22 = arith.constant 0 : index
    %c0_23 = arith.constant 0 : index
    %c0_24 = arith.constant 0 : index
    %c0_25 = arith.constant 0 : index
    %41 = vector.load %arg9[%c0_22, %c0_23, %c0_24, %c0_25] : memref<1x1x1x128xf32, #tpu.memory_space<vmem>>, vector<1x1x1x128xf32>
    %42 = vector.shape_cast %41 : vector<1x1x1x128xf32> to vector<1x128xf32>
    %43 = vector.shape_cast %40 : vector<1x128xf32> to vector<1x1x1x128xf32>
    tpu.vector_store %arg9[%c0_22, %c0_23, %c0_24, %c0_25], %43 {strides = array<i32>} : memref<1x1x1x128xf32, #tpu.memory_space<vmem>>, vector<1x1x1x128xf32>,
    %cst_26 = arith.constant dense<0.000000e+00> : vector<128xf32>
    %44 = vector.multi_reduction <add>, %26, %cst_26 [0] : vector<16x128xf32> to vector<128xf32>
    %45 = vector.shape_cast %44 : vector<128xf32> to vector<1x128xf32>
    %c0_27 = arith.constant 0 : index
    %c0_28 = arith.constant 0 : index
    %c0_29 = arith.constant 0 : index
    %c0_30 = arith.constant 0 : index
    %46 = vector.load %arg10[%c0_27, %c0_28, %c0_29, %c0_30] : memref<1x1x1x128xf32, #tpu.memory_space<vmem>>, vector<1x1x1x128xf32>
    %47 = vector.shape_cast %46 : vector<1x1x1x128xf32> to vector<1x128xf32>
    %48 = vector.shape_cast %45 : vector<1x128xf32> to vector<1x1x1x128xf32>
    tpu.vector_store %arg10[%c0_27, %c0_28, %c0_29, %c0_30], %48 {strides = array<i32>} : memref<1x1x1x128xf32, #tpu.memory_space<vmem>>, vector<1x1x1x128xf32>,
    return
  }
  func.func @transform_0(%arg0: i32, %arg1: i32) -> (i32, i32, i32) {
    %c0_i32 = arith.constant 0 : i32
    %c0_i32_0 = arith.constant 0 : i32
    return %arg0, %arg1, %c0_i32 : i32, i32, i32
  }
  func.func @transform_1(%arg0: i32, %arg1: i32) -> (i32, i32, i32) {
    %c0_i32 = arith.constant 0 : i32
    %c0_i32_0 = arith.constant 0 : i32
    %c0_i32_1 = arith.constant 0 : i32
    return %arg0, %c0_i32, %c0_i32_0 : i32, i32, i32
  }
  func.func @transform_2(%arg0: i32, %arg1: i32) -> (i32, i32, i32) {
    %c0_i32 = arith.constant 0 : i32
    %c0_i32_0 = arith.constant 0 : i32
    return %arg0, %arg1, %c0_i32 : i32, i32, i32
  }
  func.func @transform_3(%arg0: i32, %arg1: i32) -> (i32, i32) {
    %c0_i32 = arith.constant 0 : i32
    %c0_i32_0 = arith.constant 0 : i32
    %c0_i32_1 = arith.constant 0 : i32
    return %c0_i32, %c0_i32_0 : i32, i32
  }
  func.func @transform_4(%arg0: i32, %arg1: i32) -> (i32, i32) {
    %c0_i32 = arith.constant 0 : i32
    %c0_i32_0 = arith.constant 0 : i32
    %c0_i32_1 = arith.constant 0 : i32
    return %c0_i32, %c0_i32_0 : i32, i32
  }
  func.func @transform_5(%arg0: i32, %arg1: i32) -> (i32, i32) {
    %c0_i32 = arith.constant 0 : i32
    %c0_i32_0 = arith.constant 0 : i32
    %c0_i32_1 = arith.constant 0 : i32
    return %c0_i32, %c0_i32_0 : i32, i32
  }
  func.func @transform_6(%arg0: i32, %arg1: i32) -> (i32, i32, i32) {
    %c0_i32 = arith.constant 0 : i32
    %c0_i32_0 = arith.constant 0 : i32
    return %arg0, %arg1, %c0_i32 : i32, i32, i32
  }
  func.func @transform_7(%arg0: i32, %arg1: i32) -> (i32, i32, i32, i32) {
    %c0_i32 = arith.constant 0 : i32
    %c0_i32_0 = arith.constant 0 : i32
    %c0_i32_1 = arith.constant 0 : i32
    return %arg0, %arg1, %c0_i32, %c0_i32_0 : i32, i32, i32, i32
  }
  func.func @transform_8(%arg0: i32, %arg1: i32) -> (i32, i32, i32, i32) {
    %c0_i32 = arith.constant 0 : i32
    %c0_i32_0 = arith.constant 0 : i32
    %c0_i32_1 = arith.constant 0 : i32
    return %arg0, %arg1, %c0_i32, %c0_i32_0 : i32, i32, i32, i32
  }
}

</mosaic_0001>

<bundles_post_ra>
// kernel: joint_with_bert_forward.1
= control target key start
LH: loop header
LB: loop body
LE: loop exit
PB: predicated region body
PF: predicated region fallthrough
CT: control target
= control target key end

     0   :  { %s1070_s27 = smov 0   ;;  %s1072_s28 = smov 0   ;;  %s1173_s0 = inlined_call_operand.vmem [shape: bf16[2,16,32], index: 0, kind: input, shape index: {}]   ;;  %s1174_s1 = inlined_call_operand.vmem [shape: f32[2,1,128], index: 1, kind: input, shape index: {}]   ;;  %s1175_s2 = inlined_call_operand.vmem [shape: s32[2,16,1], index: 2, kind: input, shape index: {}]   ;;  %s1176_s3 = inlined_call_operand.vmem [shape: bf16[32,128], index: 3, kind: input, shape index: {}]   ;;  %s1177_s4 = inlined_call_operand.vmem [shape: bf16[128,128], index: 4, kind: input, shape index: {}]   ;;  %s1178_s5 = inlined_call_operand.vmem [shape: f32[1,128], index: 5, kind: input, shape index: {}]   ;;  %s1179_s6 = inlined_call_operand.vmem [shape: bf16[2,16,128], index: 6, kind: output, shape index: {0}]   ;;  %s1180_s7 = inlined_call_operand.vmem [shape: f32[2,1,1,128], index: 7, kind: output, shape index: {1}]   ;;  %s1181_s8 = inlined_call_operand.vmem [shape: f32[2,1,1,128], index: 8, kind: output, shape index: {2}]  }
   0x1   :  { %s1074_s29 = smov 0  }
   0x2 LB: > { %s31_s30 = sadd.s32 1, %s1016_s28  ;;  %p873_p0 = scmp.ge.s32.totalorder %s1020_s29, 1  ;;  %s1020_s29 = sphi %s1074_s29, %s19_s29   ;;  %s1016_s28 = sphi %s1072_s28, %s1183_s28   ;;  %s1012_s27 = sphi %s1070_s27, %s1182_s27  }
   0x3   : > { %p33_p1 = scmp.ge.s32.totalorder %s31_s30, 2  ;;  %p317_p2 = scmp.lt.s32.totalorder %s1020_s29, 3 }
   0x5   : > { %s1185_s30 = smov (%p33_p1, %s31_s30), 0  ;;  %p318_p3 = pnand %p873_p0, %p317_p2 }
   0x6   : > { %p384_p4 = scmp.lt.s32.totalorder (!%p318_p3), %s1012_s27, 1 }
   0x7   : > { %321 = sbr.rel (%p318_p3) target bundleno = 754 (0x2f2), region = 44 }
   0xc   : > { %v979_v0 = vld [vmem:[%s1176_s3 + $0x8] sm:$0xff]   ;;  %v1022_v1 = vmov 0.0   ;;  %v980_v2 = vld [vmem:[%s1176_s3] sm:$0xff]   ;;  %vm1023_vm0 = vmmov 0   ;;  %v982_v3 = vld [vmem:[%s1177_s4 + $0x38] sm:$0xff]   ;;  %s1187_s27 = smov (!%p384_p4, %s1012_s27), 1  ;;  %v631_v41 = vlaneseq }
   0xd   : > { %922 = vmatprep.subr.bf16.mxu0 %v1022_v1  ;;  %930 = vmatprep.subr.bf16.mxu1 %v1022_v1  ;;  %v983_v4 = vld [vmem:[%s1177_s4 + $0x30] sm:$0xff]   ;;  %s900_s17 = sshll.u32 %s1187_s27, 3  ;;  %vm459_vm1 = vcmask 261120   ;;  %v984_v5 = vld [vmem:[%s1177_s4 + $0x28] sm:$0xff]   ;;  %v985_v7 = vld [vmem:[%s1177_s4 + $0x20] sm:$0xff]   ;;  %s395_s18 = scalar_lea.vmem %s1174_s1, %s1187_s27  ;;  %v1024_v30 = vmov 0  }
   0xe   : > { %923 = vmatpush3.bf16.msra.mxu0 %v979_v0  ;;  %926 = vmatprep.mubr.msk.bf16.mxu0 %vm1023_vm0, %v1022_v1  ;;  %s391_s20 = scalar_lea.vmem %s1173_s0, %s900_s17  ;;  %v986_v8 = vld [vmem:[%s1177_s4 + $0x18] sm:$0xff]   ;;  %v987_v9 = vld [vmem:[%s1177_s4 + $0x10] sm:$0xff]   ;;  %v988_v10 = vld [vmem:[%s1177_s4 + $0x8] sm:$0xff]   ;;  %s414_s23 = scalar_lea.vmem %s1179_s6, %s900_s17  ;;  %v632_v43 = vand.u32 127, %v631_v41 }
   0xf   : > { %924 = vmatprep.subr.bf16.mxu0 %v1022_v1  ;;  %946 = vmatprep.mubr.msk.bf16.mxu1 %vm1023_vm0, %v1022_v1  ;;  %v981_v6 = vld [vmem:[%s391_s20] sm:$0xff]   ;;  %s901_s24 = sshll.u32 %s1187_s27, 4  ;;  %s427_s11 = scalar_lea.vmem %s1181_s8, %s1187_s27 }
  0x10   : > { %931 = vmatpush3.bf16.msra.mxu1 %v982_v3  ;;  %v989_v11 = vld [vmem:[%s1177_s4] sm:$0xff]   ;;  %978 = vset.pattern.permute.xlu1 %v1024_v30  ;;  %s404_s9 = scalar_lea.vmem %s1175_s2, %s901_s24  ;;  %s421_s14 = scalar_lea.vmem %s1180_s7, %s1187_s27 }
  0x11   : > { %932 = vmatprep.subr.bf16.mxu1 %v1022_v1  ;;  %v880_v12 = vld [vmem:[%s395_s18] ss:$0 sm:$0xff]  ;;  %977 = vset.pattern.permute.xlu0 %v1024_v30  ;;  %v630_v40 = vld [vmem:[%s404_s9 + $0x8] sm:$0xff] }
  0x12   : > { %925 = vmatpush3.bf16.msra.mxu0 %v980_v2  ;;  %v885_v22 = vld [vmem:[%s1178_s5] ss:$0 sm:$0xff] }
  0x13   : > { %v629_v31 = vld [vmem:[%s404_s9] sm:$0xff] }
  0x14   : > { %933 = vmatpush3.bf16.msra.mxu1 %v983_v4 }
  0x15   : > { %927 = vmatmul.mubr.msk.bf16.vlgmr.msra.gmra.mxu0 %vm459_vm1, %v981_v6  ;;  %934 = vmatprep.subr.bf16.mxu1 %v1022_v1 }
  0x18   : > { %935 = vmatpush3.bf16.msra.mxu1 %v984_v5 }
  0x19   : > { %936 = vmatprep.subr.bf16.mxu1 %v1022_v1 }
  0x1c   : > { %937 = vmatpush3.bf16.msra.mxu1 %v985_v7 }
  0x1d   : > { %938 = vmatprep.subr.bf16.mxu1 %v1022_v1 }
  0x20   : > { %939 = vmatpush3.bf16.msra.mxu1 %v986_v8 }
  0x21   : > { %940 = vmatprep.subr.bf16.mxu1 %v1022_v1 }
  0x24   : > { %941 = vmatpush3.bf16.msra.mxu1 %v987_v9 }
  0x25   : > { %942 = vmatprep.subr.bf16.mxu1 %v1022_v1 }
  0x28   : > { %943 = vmatpush3.bf16.msra.mxu1 %v988_v10 }
  0x29   : > { %944 = vmatprep.subr.bf16.mxu1 %v1022_v1 }
  0x2c   : > { %945 = vmatpush3.bf16.msra.mxu1 %v989_v11 }
  0xd5   : > { %v497_v13 = vpop.f32.mrf.mxu0 }
  0xd6   : > { %v498_v15 = vadd.f32 %v880_v12, %v497_v13 }
  0xd7   : > { %v928_v14 = vpop.f32.mrf.mxu0 }
  0xd8   : > { %v504_v19 = vmax.f32 %v498_v15, 0.0 }
  0xd9   : > { %v500_v16 = vpop.f32.mrf.mxu0 }
  0xda   : > { %v501_v17 = vadd.f32 %v880_v12, %v500_v16 }
  0xdb   : > { %v929_v18 = vpop.f32.mrf.mxu0 }
  0xdc   : > { %v505_v20 = vmax.f32 %v501_v17, 0.0 }
  0xde   : > { %v506_v21 = vpack.c.bf16 %v505_v20, %v504_v19 }
  0xe0   : > { %947 = vmatmul.mubr.bf16.vlgmr.msra.gmra.mxu1 %v506_v21 }
 0x1a0   : > { %v612_v23 = vpop.f32.mrf.mxu1 }
 0x1a1   : > { %v613_v24 = vadd.f32 %v885_v22, %v612_v23 }
 0x1a2   : > { %v948_v25 = vpop.f32.mrf.mxu1 }
 0x1a3   : > { %645 = vmax.xlane.f32.xlu0 %v613_v24 }
 0x1a4   : > { %v615_v26 = vpop.f32.mrf.mxu1 }
 0x1a5   : > { %v616_v27 = vadd.f32 %v885_v22, %v615_v26 }
 0x1a6   : > { %v949_v28 = vpop.f32.mrf.mxu1 }
 0x1a7   : > { %v908_v29 = vpack.c.bf16 %v616_v27, %v613_v24  ;;  %647 = vmax.xlane.f32.xlu0 %v616_v27 }
 0x1a9   : > { %909 = vst [vmem:[%s414_s23] sm:$0xff] %v908_v29  }
 0x1bd   : > { %634 = vperm.xlu0 %977, %v629_v31  }
 0x22c   : > { %v646_v32 = vpop.xlane.xlu0 %645 }
 0x22d   : > { %v649_v33 = vsub.f32 %v613_v24, %v646_v32 }
 0x22f   : > { %v651_v34 = vmul.f32 1.442695, %v649_v33 }
 0x230   : > { %v648_v35 = vpop.xlane.xlu0 %647 }
 0x231   : > { %990 = vpow2.f32 %v651_v34  ;;  %v650_v36 = vsub.f32 %v616_v27, %v648_v35 }
 0x233   : > { %v653_v37 = vmul.f32 1.442695, %v650_v36 }
 0x235   : > { %992 = vpow2.f32 %v653_v37 }
 0x238   : > { %v635_v44 = vpop.permute.xlu0 %634 }
 0x239   : > { %vm639_vm2 = vcmp.eq.s32.totalorder %v632_v43, %v635_v44 }
 0x23a   : > { %v896_v47 = vsel %vm639_vm2, 1.0, %v1022_v1 }
 0x23e   : > { %v991_v38 = vpop.eup %990 }
 0x23f   : > { %655 = vadd.xlane.f32.xlu1 %v991_v38 }
 0x242   : > { %v993_v39 = vpop.eup %992 }
 0x243   : > { %657 = vadd.xlane.f32.xlu1 %v993_v39 }
 0x254   : > { %637 = vperm.xlu1 %978, %v630_v40  }
 0x2c8   : > { %v656_v42 = vpop.xlane.xlu1 %655 }
 0x2c9   : > { %994 = vlog2.f32 %v656_v42 }
 0x2cc   : > { %v658_v45 = vpop.xlane.xlu1 %657 }
 0x2cd   : > { %996 = vlog2.f32 %v658_v45 }
 0x2d0   : > { %v638_v46 = vpop.permute.xlu1 %637 }
 0x2d1   : > { %vm640_vm3 = vcmp.eq.s32.totalorder %v632_v43, %v638_v46 }
 0x2d2   : > { %v897_v48 = vsel %vm640_vm3, 1.0, %v1022_v1 }
 0x2d3   : > { %v677_v49 = vadd.f32 %v897_v48, %v896_v47 }
 0x2d5   : > { %v678_v50 = vrot.slane %v677_v49, 4 }
 0x2d6   : > { %v995_v51 = vpop.eup %994 }
 0x2d7   : > { %v660_v52 = vmul.f32 0.6931472, %v995_v51  ;;  %v679_v53 = vadd.f32 %v678_v50, %v677_v49 }
 0x2d9   : > { %v663_v54 = vadd.f32 %v660_v52, %v646_v32  ;;  %v680_v55 = vrot.slane %v679_v53, 2 }
 0x2da   : > { %v997_v56 = vpop.eup %996 }
 0x2db   : > { %v662_v57 = vmul.f32 0.6931472, %v997_v56  ;;  %v681_v58 = vadd.f32 %v680_v55, %v679_v53  ;;  %v665_v60 = vsub.f32 %v663_v54, %v613_v24 }
 0x2dd   : > { %v664_v59 = vadd.f32 %v662_v57, %v648_v35  ;;  %v682_v61 = vrot.slane %v681_v58, 1  ;;  %v667_v1 = vmul.f32 %v896_v47, %v665_v60 }
 0x2df   : > { %v666_v62 = vsub.f32 %v664_v59, %v616_v27  ;;  %v683_v63 = vadd.f32 %v682_v61, %v681_v58 }
 0x2e1   : > { %v668_v0 = vmul.f32 %v897_v48, %v666_v62  ;;  %684 = vst [vmem:[%s427_s11] sm:$0x1] %v683_v63 }
 0x2e3   : > { %v669_v2 = vadd.f32 %v668_v0, %v667_v1 }
 0x2e5   : > { %v670_v3 = vrot.slane %v669_v2, 4 }
 0x2e7   : > { %v671_v4 = vadd.f32 %v670_v3, %v669_v2 }
 0x2e9   : > { %v672_v5 = vrot.slane %v671_v4, 2 }
 0x2eb   : > { %v673_v6 = vadd.f32 %v672_v5, %v671_v4 }
 0x2ed   : > { %v674_v7 = vrot.slane %v673_v6, 1 }
 0x2ef   : > { %v675_v8 = vadd.f32 %v674_v7, %v673_v6 }
 0x2f1   : > { %676 = vst [vmem:[%s421_s14] sm:$0x1] %v675_v8 }
 0x2f2 PF: > { %s19_s29 = sadd.s32 1, %s1020_s29   ;;  %s1182_s27 = smov %s1016_s28 }
 0x2f3   : > { %p16_p5 = scmp.ge.s32.totalorder %s19_s29, 4   ;;  %s1183_s28 = smov %s1185_s30 }
 0x2f5   :  { %18 = sbr.rel (!%p16_p5) target bundleno = 2 (0x2), region = 104 }

</bundles_post_ra>
